<compile_context>
chip_gen: v6e
topology: v6e:2x2x1
jax: 0.10.0
libtpu: 0.0.40
codegen_flags: <defaults>
</compile_context>

<pallas_src>
import functools

import jax
import jax.numpy as jnp
from jax import lax
from jax.experimental import pallas as pl
from jax.experimental.pallas import tpu as pltpu

BN_EPS = 1e-5


def _round_up(x, m):
    return (x + m - 1) // m * m


def _cdiv(a, b):
    return (a + b - 1) // b


def _vmem_capacity_bytes():
    try:
        return int(pltpu.get_tpu_info().vmem_capacity_bytes)
    except Exception:
        return 64 << 20  # conservative fallback (v7x per-TensorCore VMEM)


# ---------------------------------------------------------------------------
# Kernels
# ---------------------------------------------------------------------------
def _nin_kernel(x_ref, wt_ref, b_ref, o_ref):
    # [tm, Kp] @ [Kp, Dp] on the MXU, f32 accumulation, fused bias + ReLU.
    y = jnp.dot(x_ref[...], wt_ref[...], preferred_element_type=jnp.float32)
    y = y + b_ref[...]
    o_ref[...] = jnp.maximum(y, 0.0).astype(o_ref.dtype)


def _nin_kernel_ktiled(x_ref, wt_ref, b_ref, o_ref, acc_ref):
    # K-tiled variant for large D: accumulate partial products in f32 VMEM.
    k = pl.program_id(1)

    @pl.when(k == 0)
    def _():
        acc_ref[...] = jnp.zeros_like(acc_ref)

    acc_ref[...] += jnp.dot(x_ref[...], wt_ref[...],
                            preferred_element_type=jnp.float32)

    @pl.when(k == pl.num_programs(1) - 1)
    def _():
        y = acc_ref[...] + b_ref[...]
        o_ref[...] = jnp.maximum(y, 0.0).astype(o_ref.dtype)


# ---------------------------------------------------------------------------
# Wrapper
# ---------------------------------------------------------------------------
@functools.partial(jax.jit, static_argnames=("tm", "compute_dtype"))
def nin_forward(xs, w, b_conv, gamma, beta, run_mean, run_var, *,
                tm=512, compute_dtype=jnp.bfloat16):
    """xs: [B, T, D].  w: [D, D] 1x1-conv weight (out_ch, in_ch)."""
    B, T, D = xs.shape
    N = B * T
    out_dtype = xs.dtype
    compute_dtype = jnp.dtype(compute_dtype)

    # --- Fold BatchNorm (inference) + conv bias into (W', b'), in f32.
    scale = gamma.astype(jnp.float32) * lax.rsqrt(
        run_var.astype(jnp.float32) + BN_EPS)                       # [D]
    w_fold = w.astype(jnp.float32) * scale[:, None]                 # [D_out, D_in]
    b_fold = ((b_conv.astype(jnp.float32) - run_mean.astype(jnp.float32))
              * scale + beta.astype(jnp.float32))                   # [D]

    in_item = compute_dtype.itemsize
    out_item = jnp.dtype(out_dtype).itemsize
    row_align = 16 if in_item == 2 else 8        # packed sublane tile for bf16

    # Lane-dense output channel padding; 256-wide for big bf16 (MXU is 256x256
    # on v6e/v7x) when the extra padding is a small fraction of traffic.
    lane_align = 256 if (in_item == 2 and D >= 1024) else 128
    Dp = max(_round_up(D, lane_align), 128)

    # --- Generation-aware VMEM budget (v7x 64 MiB vs v5e/v6e 128 MiB).
    vmem_cap = _vmem_capacity_bytes()
    vmem_budget = int(vmem_cap * 0.72)

    weight_resident = Dp * Dp * in_item          # single-buffered (Buffered(1))
    single_pass = weight_resident <= vmem_budget // 2

    if single_pass:
        Kp, tk, nk = Dp, Dp, 1
        weight_block_bytes = weight_resident
        per_row_bytes = 2 * Kp * in_item + 2 * Dp * out_item   # x + out, 2 bufs
    else:
        # K-tiled path: double-buffered (tk, Dp) weight slab <= ~1/3 of budget.
        nk = max(2, _cdiv(2 * Dp * Dp * in_item, max(vmem_budget // 3, 1)))
        tk = _round_up(_cdiv(Dp, nk), 128)
        Kp = tk * _cdiv(Dp, tk)
        nk = Kp // tk
        weight_block_bytes = 2 * tk * Dp * in_item
        per_row_bytes = 2 * tk * in_item + Dp * 4 + 2 * Dp * out_item

    # --- Row tile under the VMEM budget.
    avail = max(vmem_budget - weight_block_bytes, row_align * per_row_bytes)
    tm_cap = max(row_align, (avail // per_row_bytes) // row_align * row_align)
    tm_eff = min(tm, tm_cap)
    # Keep >= ~4 row-grid steps so both v7x TensorCores get work (but tiles
    # stay >= 128 rows when there is enough work to warrant it).
    tm_eff = min(tm_eff, max(128, _round_up(_cdiv(N, 4), row_align)))
    if N <= tm_eff:
        tm_eff = N                       # one block; block dim == full row dim
    else:
        tm_eff = max(row_align, (tm_eff // row_align) * row_align)
    grid_m = _cdiv(N, tm_eff)

    # --- Prepare operands (zero-copy when already aligned / right dtype).
    x2d = xs.reshape(N, D)
    if Kp != D:
        x2d = jnp.pad(x2d, ((0, 0), (0, Kp - D)))
    if x2d.dtype != compute_dtype:
        x2d = x2d.astype(compute_dtype)

    wt = w_fold.T                                                # [D_in, D_out]
    if Kp != D or Dp != D:
        wt = jnp.pad(wt, ((0, Kp - D), (0, Dp - D)))
    wt = wt.astype(compute_dtype)

    bvec = b_fold
    if Dp != D:
        bvec = jnp.pad(bvec, (0, Dp - D))
    bvec = bvec.reshape(1, Dp).astype(jnp.float32)

    # --- Specs.
    if single_pass:
        kernel = _nin_kernel
        grid = (grid_m,)
        in_specs = [
            pl.BlockSpec((tm_eff, Kp), lambda i: (i, 0)),
            pl.BlockSpec((Kp, Dp), lambda i: (0, 0),
                         pipeline_mode=pl.Buffered(1)),
            pl.BlockSpec((1, Dp), lambda i: (0, 0),
                         pipeline_mode=pl.Buffered(1)),
        ]
        out_spec = pl.BlockSpec((tm_eff, Dp), lambda i: (i, 0))
        scratch = ()
        dim_sem = ("parallel",)
    else:
        kernel = _nin_kernel_ktiled
        grid = (grid_m, nk)
        in_specs = [
            pl.BlockSpec((tm_eff, tk), lambda i, k: (i, k)),
            pl.BlockSpec((tk, Dp), lambda i, k: (k, 0)),
            pl.BlockSpec((1, Dp), lambda i, k: (0, 0),
                         pipeline_mode=pl.Buffered(1)),
        ]
        out_spec = pl.BlockSpec((tm_eff, Dp), lambda i, k: (i, 0))
        scratch = (pltpu.VMEM((tm_eff, Dp), jnp.float32),)
        dim_sem = ("parallel", "arbitrary")

    vmem_need = weight_block_bytes + tm_eff * per_row_bytes + 2 * Dp * 4
    vmem_limit = max(16 << 20, min(int(vmem_cap * 0.9), vmem_need + (8 << 20)))

    out2d = pl.pallas_call(
        kernel,
        out_shape=jax.ShapeDtypeStruct((N, Dp), out_dtype),
        grid_spec=pltpu.PrefetchScalarGridSpec(
            num_scalar_prefetch=0,
            grid=grid,
            in_specs=in_specs,
            out_specs=out_spec,
            scratch_shapes=scratch,
        ),
        compiler_params=pltpu.CompilerParams(
            dimension_semantics=dim_sem,
            vmem_limit_bytes=vmem_limit,
        ),
    )(x2d, wt, bvec)

    if Dp != D:
        out2d = out2d[:, :D]
    return out2d.reshape(B, T, D)


def nin_reference(xs, w, b_conv, gamma, beta, run_mean, run_var):
    y = jnp.einsum("btd,cd->btc", xs, w) + b_conv
    y = (y - run_mean) * lax.rsqrt(run_var + BN_EPS) * gamma + beta
    return jnp.maximum(y, 0.0)


if __name__ == "__main__":
    B, T, D = 2, 8, 32
    key = jax.random.PRNGKey(0)
    kx, kw, kb, kg, kbe, km, kv = jax.random.split(key, 7)

    xs = jax.random.normal(kx, (B, T, D), dtype=jnp.float32)
    # Conv2d(dim, dim, kernel_size=1) parameters: weight [D, D, 1, 1] -> [D, D]
    w = jax.random.normal(kw, (D, D), dtype=jnp.float32) * (1.0 / jnp.sqrt(D))
    b_conv = jax.random.normal(kb, (D,), dtype=jnp.float32) * 0.1
    # BatchNorm2d(dim) parameters / running stats (inference mode).
    gamma = 1.0 + 0.1 * jax.random.normal(kg, (D,), dtype=jnp.float32)
    beta = 0.1 * jax.random.normal(kbe, (D,), dtype=jnp.float32)
    run_mean = 0.1 * jax.random.normal(km, (D,), dtype=jnp.float32)
    run_var = jnp.abs(1.0 + 0.1 * jax.random.normal(kv, (D,),
                                                    dtype=jnp.float32))

    ref = nin_reference(xs, w, b_conv, gamma, beta, run_mean, run_var)

    # Exact (f32) path: tight tolerance.
    out_f32 = nin_forward(xs, w, b_conv, gamma, beta, run_mean, run_var,
                          compute_dtype=jnp.float32)
    jax.block_until_ready(out_f32)
    assert out_f32.shape == (B, T, D)
    assert jnp.allclose(out_f32, ref, atol=1e-4, rtol=1e-4), (
        float(jnp.max(jnp.abs(out_f32 - ref))))

    # Default bf16-I/O path (f32 accumulation): loose tolerance.
    out_bf16 = nin_forward(xs, w, b_conv, gamma, beta, run_mean, run_var)
    jax.block_until_ready(out_bf16)
    assert out_bf16.shape == (B, T, D)
    assert jnp.allclose(out_bf16, ref, atol=5e-2, rtol=5e-2), (
        float(jnp.max(jnp.abs(out_bf16 - ref))))

    print("KERNEL_OK")
</pallas_src>

<mosaic_0001>
module attributes {stable_mosaic.version = 11 : i64} {
  func.func @_nin_kernel(%arg0: i32, %arg1: memref<16x128xf32, #tpu.memory_space<vmem>>, %arg2: memref<128x128xf32, #tpu.memory_space<vmem>>, %arg3: memref<1x128xf32, #tpu.memory_space<vmem>>, %arg4: memref<16x128xf32, #tpu.memory_space<vmem>>) attributes {dimension_semantics = [#tpu.dimension_semantics<parallel>], iteration_bounds = array<i64: 1>, scalar_prefetch = 0 : i64, scratch_operands = 0 : i64, tpu.core_type = #tpu.core_type<tc>, window_params = [{transform_indices = @transform_0, window_bounds = array<i64: 16, 128>}, {pipeline_mode = #tpu.pipeline_mode<synchronous>, transform_indices = @transform_1, window_bounds = array<i64: 128, 128>}, {pipeline_mode = #tpu.pipeline_mode<synchronous>, transform_indices = @transform_2, window_bounds = array<i64: 1, 128>}, {transform_indices = @transform_3, window_bounds = array<i64: 16, 128>}]} {
    %c0 = arith.constant 0 : index
    %c0_0 = arith.constant 0 : index
    %0 = vector.load %arg1[%c0, %c0_0] : memref<16x128xf32, #tpu.memory_space<vmem>>, vector<16x128xf32>
    %c0_1 = arith.constant 0 : index
    %c0_2 = arith.constant 0 : index
    %1 = vector.load %arg2[%c0_1, %c0_2] : memref<128x128xf32, #tpu.memory_space<vmem>>, vector<128x128xf32>
    %cst = arith.constant dense<0.000000e+00> : vector<16x128xf32>
    %2 = tpu.matmul %0, %1, %cst {dimension_numbers = #tpu.dot_dimension_numbers<[1], [0], [0], [1], [0, 0, 1, 1], [], []>} : vector<16x128xf32>, vector<128x128xf32>, vector<16x128xf32> -> vector<16x128xf32>
    %c0_3 = arith.constant 0 : index
    %c0_4 = arith.constant 0 : index
    %3 = vector.load %arg3[%c0_3, %c0_4] : memref<1x128xf32, #tpu.memory_space<vmem>>, vector<1x128xf32>
    %4 = vector.broadcast %3 : vector<1x128xf32> to vector<16x128xf32>
    %5 = arith.addf %2, %4 : vector<16x128xf32>
    %cst_5 = arith.constant 0.000000e+00 : f32
    %6 = vector.broadcast %cst_5 : f32 to vector<16x128xf32>
    %7 = arith.maximumf %5, %6 : vector<16x128xf32>
    %c0_6 = arith.constant 0 : index
    %c0_7 = arith.constant 0 : index
    %8 = vector.load %arg4[%c0_6, %c0_7] : memref<16x128xf32, #tpu.memory_space<vmem>>, vector<16x128xf32>
    tpu.vector_store %arg4[%c0_6, %c0_7], %7 {strides = array<i32>} : memref<16x128xf32, #tpu.memory_space<vmem>>, vector<16x128xf32>,
    return
  }
  func.func @transform_0(%arg0: i32) -> (i32, i32) {
    %c0_i32 = arith.constant 0 : i32
    %c0_i32_0 = arith.constant 0 : i32
    return %arg0, %c0_i32 : i32, i32
  }
  func.func @transform_1(%arg0: i32) -> (i32, i32) {
    %c0_i32 = arith.constant 0 : i32
    %c0_i32_0 = arith.constant 0 : i32
    %c0_i32_1 = arith.constant 0 : i32
    return %c0_i32, %c0_i32_0 : i32, i32
  }
  func.func @transform_2(%arg0: i32) -> (i32, i32) {
    %c0_i32 = arith.constant 0 : i32
    %c0_i32_0 = arith.constant 0 : i32
    %c0_i32_1 = arith.constant 0 : i32
    return %c0_i32, %c0_i32_0 : i32, i32
  }
  func.func @transform_3(%arg0: i32) -> (i32, i32) {
    %c0_i32 = arith.constant 0 : i32
    %c0_i32_0 = arith.constant 0 : i32
    return %arg0, %c0_i32 : i32, i32
  }
}

</mosaic_0001>

<bundles_post_ra>
// kernel: nin_forward.1
= control target key start
LH: loop header
LB: loop body
LE: loop exit
PB: predicated region body
PF: predicated region fallthrough
CT: control target
= control target key end

     0   :  { %s259_s1 = inlined_call_operand.vmem [shape: f32[128,128], index: 1, kind: input, shape index: {}]   ;;  %s260_s0 = inlined_call_operand.vmem [shape: f32[16,128], index: 0, kind: input, shape index: {}]   ;;  %s261_s2 = inlined_call_operand.vmem [shape: f32[1,128], index: 2, kind: input, shape index: {}]   ;;  %s262_s3 = inlined_call_operand.vmem [shape: f32[16,128], index: 3, kind: output, shape index: {}]  }
   0x1   :  { %v31_v0 = vld [vmem:[%s259_s1 + $0x78] sm:$0xff]  ;;  %v30_v1 = vld [vmem:[%s259_s1 + $0x70] sm:$0xff]  ;;  %v29_v2 = vld [vmem:[%s259_s1 + $0x68] sm:$0xff] }
   0x2   :  { %141 = vmatprep.subr.mxu0 %v31_v0  ;;  %v28_v3 = vld [vmem:[%s259_s1 + $0x60] sm:$0xff]  ;;  %v27_v5 = vld [vmem:[%s259_s1 + $0x58] sm:$0xff]  ;;  %v26_v6 = vld [vmem:[%s259_s1 + $0x50] sm:$0xff] }
   0x3   :  { %142 = vmatpush3.msra.mxu0 %v31_v0  ;;  %v14_v4 = vld [vmem:[%s260_s0] sm:$0xff]  ;;  %v25_v7 = vld [vmem:[%s259_s1 + $0x48] sm:$0xff]  ;;  %v23_v9 = vld [vmem:[%s259_s1 + $0x38] sm:$0xff] }
   0x4   :  { %143 = vmatprep.subr.mxu0 %v30_v1  ;;  %173 = vmatprep.mubr.f32.mxu0 %v14_v4  ;;  %v24_v8 = vld [vmem:[%s259_s1 + $0x40] sm:$0xff]  ;;  %v22_v10 = vld [vmem:[%s259_s1 + $0x30] sm:$0xff]  ;;  %v21_v11 = vld [vmem:[%s259_s1 + $0x28] sm:$0xff] }
   0x5   :  { %144 = vmatpush3.msra.mxu0 %v30_v1  ;;  %v20_v12 = vld [vmem:[%s259_s1 + $0x20] sm:$0xff]  ;;  %v19_v13 = vld [vmem:[%s259_s1 + $0x18] sm:$0xff]  ;;  %v18_v14 = vld [vmem:[%s259_s1 + $0x10] sm:$0xff] }
   0x6   :  { %145 = vmatprep.subr.mxu0 %v29_v2  ;;  %v17_v15 = vld [vmem:[%s259_s1 + $0x8] sm:$0xff]  ;;  %v16_v16 = vld [vmem:[%s259_s1] sm:$0xff] }
   0x7   :  { %146 = vmatpush3.msra.mxu0 %v29_v2  ;;  %v15_v17 = vld [vmem:[%s260_s0 + $0x8] sm:$0xff]  ;;  %v122_v18 = vld [vmem:[%s261_s2] ss:$0 sm:$0xff] }
   0x8   :  { %147 = vmatprep.subr.mxu0 %v28_v3 }
   0x9   :  { %148 = vmatpush3.msra.mxu0 %v28_v3 }
   0xa   :  { %149 = vmatprep.subr.mxu0 %v27_v5 }
   0xb   :  { %150 = vmatpush3.msra.mxu0 %v27_v5 }
   0xc   :  { %151 = vmatprep.subr.mxu0 %v26_v6 }
   0xd   :  { %152 = vmatpush3.msra.mxu0 %v26_v6 }
   0xe   :  { %153 = vmatprep.subr.mxu0 %v25_v7 }
   0xf   :  { %154 = vmatpush3.msra.mxu0 %v25_v7 }
  0x10   :  { %155 = vmatprep.subr.mxu0 %v24_v8 }
  0x11   :  { %156 = vmatpush3.msra.mxu0 %v24_v8 }
  0x12   :  { %157 = vmatprep.subr.mxu0 %v23_v9 }
  0x13   :  { %158 = vmatpush3.msra.mxu0 %v23_v9 }
  0x14   :  { %159 = vmatprep.subr.mxu0 %v22_v10 }
  0x15   :  { %160 = vmatpush3.msra.mxu0 %v22_v10 }
  0x16   :  { %161 = vmatprep.subr.mxu0 %v21_v11 }
  0x17   :  { %162 = vmatpush3.msra.mxu0 %v21_v11 }
  0x18   :  { %163 = vmatprep.subr.mxu0 %v20_v12 }
  0x19   :  { %164 = vmatpush3.msra.mxu0 %v20_v12 }
  0x1a   :  { %165 = vmatprep.subr.mxu0 %v19_v13 }
  0x1b   :  { %166 = vmatpush3.msra.mxu0 %v19_v13 }
  0x1c   :  { %167 = vmatprep.subr.mxu0 %v18_v14 }
  0x1d   :  { %168 = vmatpush3.msra.mxu0 %v18_v14 }
  0x1e   :  { %169 = vmatprep.subr.mxu0 %v17_v15 }
  0x1f   :  { %170 = vmatpush3.msra.mxu0 %v17_v15 }
  0x20   :  { %171 = vmatprep.subr.mxu0 %v16_v16 }
  0x21   :  { %172 = vmatpush3.msra.mxu0 %v16_v16 }
  0x22   :  { %174 = vmatmul.mubr.f32.vlgmr.msra.gmra.mxu0 %v15_v17 }
  0xe2   :  { %v175_v19 = vpop.f32.mrf.mxu0 }
  0xe3   :  { %v111_v20 = vadd.f32 %v175_v19, %v122_v18 }
  0xe4   :  { %v105_v21 = vpop.f32.mrf.mxu0 }
  0xe5   :  { %v115_v22 = vmax.f32 %v111_v20, 0.0  ;;  %v106_v23 = vadd.f32 %v122_v18, %v105_v21 }
  0xe7   :  { %117 = vst [vmem:[%s262_s3 + $0x8] sm:$0xff] %v115_v22  ;;  %v114_v24 = vmax.f32 %v106_v23, 0.0 }
  0xe9   :  { %116 = vst [vmem:[%s262_s3] sm:$0xff] %v114_v24 }

</bundles_post_ra>
